<compile_context>
chip_gen: v7x
topology: tpu7x:2x2x1
jax: 0.10.0
libtpu: 0.0.40
codegen_flags: <defaults>
</compile_context>

<pallas_src>
import functools

import jax
import jax.numpy as jnp
from jax.experimental import pallas as pl
from jax.experimental.pallas import tpu as pltpu

_LANE = 128
_MXU_ALIGN = 128                 # row-tile alignment; MXU-friendly on v5e/v6e/v7x
_DEF_MXU_DTYPE = jnp.bfloat16    # MXU input dtype (f32 accumulation)


# ------------------------------- helpers -------------------------------------

def _round_up(x, m):
    return (x + m - 1) // m * m


def _cdiv(a, b):
    return -(-a // b)


def _pad2(a, rows, cols):
    r, c = a.shape
    if (r, c) == (rows, cols):
        return a
    return jnp.pad(a, ((0, rows - r), (0, cols - c)))


@functools.lru_cache(maxsize=None)
def _vmem_limit_bytes():
    """Scoped-VMEM limit with headroom for Mosaic internal scratch / pipelining.

    ~96 MiB on v5e/v6e (128 MiB physical VMEM), ~48 MiB on v7x (64 MiB physical).
    """
    cap = 64 << 20
    try:
        cap = int(getattr(pltpu.get_tpu_info(), "vmem_capacity_bytes", cap))
    except Exception:
        pass
    return min(96 << 20, (cap * 3) // 4)


def _pick_block_m(m, bytes_per_row, *, target_bytes, align, min_tiles=2):
    """Row-tile size: VMEM-budget sized, `align`-aligned, rebalanced to minimize
    M padding, and capped so there are >= min_tiles row tiles when possible
    (megacore / v7x dual-TensorCore sharding)."""
    m8 = _round_up(max(m, 1), 8)
    if m8 <= align:
        return m8
    rows = max(align, (target_bytes // max(1, bytes_per_row)) // align * align)
    rows = min(rows, _round_up(m8, align))
    n_tiles = max(min_tiles, _cdiv(m8, rows))
    rows = _round_up(_cdiv(m8, n_tiles), align)
    return max(align, min(rows, _round_up(m8, align)))


def _fix_block_m(block_m, m):
    return _round_up(max(8, min(block_m, _round_up(m, 8))), 8)


def _prep_ln_params(gamma, beta, d_pad):
    d = gamma.shape[-1]
    g = gamma.reshape(1, d).astype(jnp.float32)
    b = beta.reshape(1, d).astype(jnp.float32)
    if d_pad != d:
        g = jnp.pad(g, ((0, 0), (0, d_pad - d)))
        b = jnp.pad(b, ((0, 0), (0, d_pad - d)))
    return g, b


def _lane_mask(d, d_pad):
    # Precomputed feature-validity mask (hoisted out of the kernel).
    return (jnp.arange(d_pad) < d).astype(jnp.float32).reshape(1, d_pad)


def _layernorm_math(x, g, b, mask, inv_d, eps):
    """PyTorch LayerNorm over the last axis of f32 `x`.  Padded feature lanes
    (zero-filled x, zero gamma/beta, mask == 0) produce exactly zero output."""
    mean = jnp.sum(x, axis=-1, keepdims=True) * inv_d     # padded lanes are 0
    xc = x - mean
    xc_m = xc * mask
    var = jnp.sum(xc_m * xc_m, axis=-1, keepdims=True) * inv_d
    inv = jax.lax.rsqrt(var + eps)                        # eps inside rsqrt (PyTorch)
    return xc * inv * g + b


# -------------------------------- kernels -------------------------------------

def _layernorm_kernel(x_ref, g_ref, b_ref, mask_ref, o_ref, *, eps, inv_d):
    x = x_ref[...].astype(jnp.float32)
    y = _layernorm_math(x, g_ref[...], b_ref[...], mask_ref[...], inv_d, eps)
    o_ref[...] = y.astype(o_ref.dtype)


def _fused_resident_kernel(x_ref, g_ref, b_ref, mask_ref, w_ref, bias_ref, o_ref,
                           *, eps, inv_d, mxu_dtype):
    # W is fully VMEM-resident; one LN + one MXU dot per row tile.
    x = x_ref[...].astype(jnp.float32)
    y = _layernorm_math(x, g_ref[...], b_ref[...], mask_ref[...], inv_d, eps)
    acc = jnp.dot(y.astype(mxu_dtype), w_ref[...],
                  preferred_element_type=jnp.float32)
    o_ref[...] = (acc + bias_ref[...]).astype(o_ref.dtype)


def _fused_stream_kernel(x_ref, g_ref, b_ref, mask_ref, w_ref, bias_ref, o_ref,
                         ln_ref, *, eps, inv_d):
    # LN computed once per row tile (j == 0) into a VMEM scratch (MXU dtype) and
    # reused across all output-column tiles j ("arbitrary" j -> scratch persists).
    @pl.when(pl.program_id(1) == 0)
    def _():
        x = x_ref[...].astype(jnp.float32)
        y = _layernorm_math(x, g_ref[...], b_ref[...], mask_ref[...], inv_d, eps)
        ln_ref[...] = y.astype(ln_ref.dtype)

    acc = jnp.dot(ln_ref[...], w_ref[...], preferred_element_type=jnp.float32)
    o_ref[...] = (acc + bias_ref[...]).astype(o_ref.dtype)


def _linear_resident_kernel(x_ref, w_ref, b_ref, o_ref, *, mxu_dtype):
    acc = jnp.dot(x_ref[...].astype(mxu_dtype), w_ref[...],
                  preferred_element_type=jnp.float32)
    o_ref[...] = (acc + b_ref[...]).astype(o_ref.dtype)


def _linear_reduce_kernel(x_ref, w_ref, b_ref, o_ref, acc_ref, *, mxu_dtype):
    kk = pl.program_id(2)

    @pl.when(kk == 0)
    def _():
        acc_ref[...] = jnp.zeros_like(acc_ref)

    acc_ref[...] += jnp.dot(x_ref[...].astype(mxu_dtype), w_ref[...],
                            preferred_element_type=jnp.float32)

    @pl.when(kk == pl.num_programs(2) - 1)
    def _():
        o_ref[...] = (acc_ref[...] + b_ref[...]).astype(o_ref.dtype)


# ----------------------------- LayerNorm wrapper ------------------------------

def layernorm_pallas(x, gamma, beta, *, eps=1e-5, block_rows=None, out_dtype=None):
    """Standalone LayerNorm over the last axis (used for generic `fn`).
    `out_dtype` can be set to bf16 to halve the HBM writeback/reload bytes when
    followed by a Pallas matmul."""
    orig_shape = x.shape
    d = orig_shape[-1]
    x2 = x.reshape(-1, d)
    m = x2.shape[0]
    d_pad = _round_up(d, _LANE)                 # lane-dense stores
    out_dtype = x.dtype if out_dtype is None else out_dtype

    vmem_limit = _vmem_limit_bytes()
    in_item = jnp.dtype(x.dtype).itemsize
    out_item = jnp.dtype(out_dtype).itemsize
    # 2x double-buffered in, 2x double-buffered out, f32 compute temps.
    bytes_per_row = d_pad * (2 * in_item + 2 * out_item + 4)
    if block_rows is None:
        block_rows = _pick_block_m(m, bytes_per_row,
                                   target_bytes=max(8 << 20, vmem_limit // 2),
                                   align=8, min_tiles=2)
    else:
        block_rows = _fix_block_m(block_rows, m)
    m_pad = _round_up(m, block_rows)

    xp = _pad2(x2, m_pad, d_pad)
    g, b = _prep_ln_params(gamma, beta, d_pad)
    mask = _lane_mask(d, d_pad)

    out = pl.pallas_call(
        functools.partial(_layernorm_kernel, eps=eps, inv_d=1.0 / d),
        out_shape=jax.ShapeDtypeStruct((m_pad, d_pad), out_dtype),
        grid=(m_pad // block_rows,),
        in_specs=[
            pl.BlockSpec((block_rows, d_pad), lambda i: (i, 0)),
            pl.BlockSpec((1, d_pad), lambda i: (0, 0)),
            pl.BlockSpec((1, d_pad), lambda i: (0, 0)),
            pl.BlockSpec((1, d_pad), lambda i: (0, 0)),
        ],
        out_specs=pl.BlockSpec((block_rows, d_pad), lambda i: (i, 0)),
        compiler_params=pltpu.CompilerParams(
            dimension_semantics=("parallel",), vmem_limit_bytes=vmem_limit),
    )(xp, g, b, mask)

    if (m_pad, d_pad) != (m, d):
        out = out[:m, :d]
    return out.reshape(orig_shape[:-1] + (d,))


# ----------------------- Fused LayerNorm + Linear wrapper ---------------------

def fused_prenorm_linear_pallas(x, gamma, beta, w, bias, *, eps=1e-5,
                                mxu_dtype=_DEF_MXU_DTYPE, block_m=None,
                                block_n=None, w_resident_bytes=None):
    """LayerNorm(x) @ w + bias; the normalized tensor never touches HBM."""
    orig_shape = x.shape
    d = orig_shape[-1]
    n = w.shape[1]
    x2 = x.reshape(-1, d)
    m = x2.shape[0]

    d_pad = _round_up(d, _LANE)
    n_pad = _round_up(n, _LANE)

    vmem_limit = _vmem_limit_bytes()
    in_item = jnp.dtype(x.dtype).itemsize
    out_item = in_item
    mxu_item = jnp.dtype(mxu_dtype).itemsize
    w_bytes = d_pad * n_pad * mxu_item
    if w_resident_bytes is None:
        w_resident_bytes = vmem_limit // 4      # ~12 MiB on v7x, ~24 MiB on v5e/v6e

    g, bta = _prep_ln_params(gamma, beta, d_pad)
    mask = _lane_mask(d, d_pad)
    inv_d = 1.0 / d

    if w_bytes <= w_resident_bytes:
        # Path A: whole W VMEM-resident (index map stays (0,0) -> single HBM read
        # of W), 1-D "parallel" grid over row tiles: both v7x TCs get work.
        wp = _pad2(w, d_pad, n_pad).astype(mxu_dtype)
        bp = _pad2(bias.reshape(1, n).astype(jnp.float32), 1, n_pad)
        bytes_per_row = d_pad * (2 * in_item + 4) + n_pad * 2 * out_item
        if block_m is None:
            budget = max(4 << 20,
                         ((vmem_limit - 2 * w_bytes - (4 << 20)) * 4) // 5)
            block_m = _pick_block_m(m, bytes_per_row, target_bytes=budget,
                                    align=_MXU_ALIGN, min_tiles=2)
        else:
            block_m = _fix_block_m(block_m, m)
        m_pad = _round_up(m, block_m)
        xp = _pad2(x2, m_pad, d_pad)

        cost = pl.CostEstimate(
            flops=2 * m_pad * d_pad * n_pad, transcendentals=m_pad,
            bytes_accessed=(xp.size * in_item + wp.size * mxu_item
                            + m_pad * n_pad * out_item))

        out = pl.pallas_call(
            functools.partial(_fused_resident_kernel, eps=eps, inv_d=inv_d,
                              mxu_dtype=mxu_dtype),
            out_shape=jax.ShapeDtypeStruct((m_pad, n_pad), x.dtype),
            grid=(m_pad // block_m,),
            in_specs=[
                pl.BlockSpec((block_m, d_pad), lambda i: (i, 0)),   # x rows
                pl.BlockSpec((1, d_pad), lambda i: (0, 0)),         # gamma
                pl.BlockSpec((1, d_pad), lambda i: (0, 0)),         # beta
                pl.BlockSpec((1, d_pad), lambda i: (0, 0)),         # lane mask
                pl.BlockSpec((d_pad, n_pad), lambda i: (0, 0)),     # W (resident)
                pl.BlockSpec((1, n_pad), lambda i: (0, 0)),         # bias
            ],
            out_specs=pl.BlockSpec((block_m, n_pad), lambda i: (i, 0)),
            compiler_params=pltpu.CompilerParams(
                dimension_semantics=("parallel",), vmem_limit_bytes=vmem_limit),
            cost_estimate=cost,
        )(xp, g, bta, mask, wp, bp)
    else:
        # Path B: W too large for residency -> stream output-column tiles.
        block_n = _round_up(min(block_n or 512, n_pad), _LANE)
        n_pad = _round_up(n, block_n)
        wp = _pad2(w, d_pad, n_pad).astype(mxu_dtype)
        bp = _pad2(bias.reshape(1, n).astype(jnp.float32), 1, n_pad)
        w_tile_bytes = d_pad * block_n * mxu_item
        bytes_per_row = (d_pad * (2 * in_item + mxu_item + 4)
                         + block_n * 2 * out_item)
        if block_m is None:
            budget = max(4 << 20,
                         ((vmem_limit - 2 * w_tile_bytes - (4 << 20)) * 4) // 5)
            block_m = _pick_block_m(m, bytes_per_row, target_bytes=budget,
                                    align=_MXU_ALIGN, min_tiles=2)
        else:
            block_m = _fix_block_m(block_m, m)
        m_pad = _round_up(m, block_m)
        xp = _pad2(x2, m_pad, d_pad)

        cost = pl.CostEstimate(
            flops=2 * m_pad * d_pad * n_pad, transcendentals=m_pad,
            bytes_accessed=(xp.size * in_item
                            + (m_pad // block_m) * wp.size * mxu_item
                            + m_pad * n_pad * out_item))

        # TODO(synk): pipeline_mode=pl.Buffered(3) on the W spec could hide more
        # DMA latency if this streaming fallback ever becomes the common case.
        out = pl.pallas_call(
            functools.partial(_fused_stream_kernel, eps=eps, inv_d=inv_d),
            out_shape=jax.ShapeDtypeStruct((m_pad, n_pad), x.dtype),
            grid=(m_pad // block_m, n_pad // block_n),
            in_specs=[
                pl.BlockSpec((block_m, d_pad), lambda i, j: (i, 0)),
                pl.BlockSpec((1, d_pad), lambda i, j: (0, 0)),
                pl.BlockSpec((1, d_pad), lambda i, j: (0, 0)),
                pl.BlockSpec((1, d_pad), lambda i, j: (0, 0)),
                pl.BlockSpec((d_pad, block_n), lambda i, j: (0, j)),
                pl.BlockSpec((1, block_n), lambda i, j: (0, j)),
            ],
            out_specs=pl.BlockSpec((block_m, block_n), lambda i, j: (i, j)),
            scratch_shapes=[pltpu.VMEM((block_m, d_pad), mxu_dtype)],
            compiler_params=pltpu.CompilerParams(
                dimension_semantics=("parallel", "arbitrary"),
                vmem_limit_bytes=vmem_limit),
            cost_estimate=cost,
        )(xp, g, bta, mask, wp, bp)

    if out.shape != (m, n):
        out = out[:m, :n]
    return out.reshape(orig_shape[:-1] + (n,))


# ------------------------- Tiled Linear (demo `fn`) ---------------------------

def linear_pallas(x, w, b, *, mxu_dtype=_DEF_MXU_DTYPE, block_m=None,
                  block_n=None, block_k=None, w_resident_bytes=None):
    orig_shape = x.shape
    k = orig_shape[-1]
    n = w.shape[1]
    x2 = x.reshape(-1, k)
    m = x2.shape[0]

    vmem_limit = _vmem_limit_bytes()
    in_item = jnp.dtype(x.dtype).itemsize
    out_item = in_item
    mxu_item = jnp.dtype(mxu_dtype).itemsize
    k_pad = _round_up(k, _LANE)
    n_pad = _round_up(n, _LANE)
    w_bytes = k_pad * n_pad * mxu_item
    if w_resident_bytes is None:
        w_resident_bytes = vmem_limit // 4

    if w_bytes <= w_resident_bytes:
        # Path A: fully resident W -> no K reduction axis, no accumulator.
        wp = _pad2(w, k_pad, n_pad).astype(mxu_dtype)
        bp = _pad2(b.reshape(1, n).astype(jnp.float32), 1, n_pad)
        bytes_per_row = k_pad * (2 * in_item + mxu_item) + n_pad * 2 * out_item
        if block_m is None:
            budget = max(4 << 20,
                         ((vmem_limit - 2 * w_bytes - (4 << 20)) * 4) // 5)
            block_m = _pick_block_m(m, bytes_per_row, target_bytes=budget,
                                    align=_MXU_ALIGN, min_tiles=2)
        else:
            block_m = _fix_block_m(block_m, m)
        m_pad = _round_up(m, block_m)
        xp = _pad2(x2, m_pad, k_pad)

        out = pl.pallas_call(
            functools.partial(_linear_resident_kernel, mxu_dtype=mxu_dtype),
            out_shape=jax.ShapeDtypeStruct((m_pad, n_pad), x.dtype),
            grid=(m_pad // block_m,),
            in_specs=[
                pl.BlockSpec((block_m, k_pad), lambda i: (i, 0)),
                pl.BlockSpec((k_pad, n_pad), lambda i: (0, 0)),
                pl.BlockSpec((1, n_pad), lambda i: (0, 0)),
            ],
            out_specs=pl.BlockSpec((block_m, n_pad), lambda i: (i, 0)),
            compiler_params=pltpu.CompilerParams(
                dimension_semantics=("parallel",), vmem_limit_bytes=vmem_limit),
        )(xp, wp, bp)
    else:
        # Path B: tiled (M, N, K) matmul with f32 VMEM accumulator.
        block_n = _round_up(min(block_n or 512, n_pad), _LANE)
        block_k = _round_up(min(block_k or 512, k_pad), _LANE)
        n_pad = _round_up(n, block_n)
        k_pad = _round_up(k, block_k)
        wp = _pad2(w, k_pad, n_pad).astype(mxu_dtype)
        bp = _pad2(b.reshape(1, n).astype(jnp.float32), 1, n_pad)
        w_tile_bytes = block_k * block_n * mxu_item
        bytes_per_row = block_k * 2 * in_item + block_n * (2 * out_item + 4)
        if block_m is None:
            budget = max(4 << 20,
                         ((vmem_limit - 2 * w_tile_bytes - (4 << 20)) * 4) // 5)
            block_m = _pick_block_m(m, bytes_per_row, target_bytes=budget,
                                    align=_MXU_ALIGN, min_tiles=2)
        else:
            block_m = _fix_block_m(block_m, m)
        m_pad = _round_up(m, block_m)
        xp = _pad2(x2, m_pad, k_pad)

        out = pl.pallas_call(
            functools.partial(_linear_reduce_kernel, mxu_dtype=mxu_dtype),
            out_shape=jax.ShapeDtypeStruct((m_pad, n_pad), x.dtype),
            grid=(m_pad // block_m, n_pad // block_n, k_pad // block_k),
            in_specs=[
                pl.BlockSpec((block_m, block_k), lambda i, j, kk: (i, kk)),
                pl.BlockSpec((block_k, block_n), lambda i, j, kk: (kk, j)),
                pl.BlockSpec((1, block_n), lambda i, j, kk: (0, j)),
            ],
            out_specs=pl.BlockSpec((block_m, block_n), lambda i, j, kk: (i, j)),
            scratch_shapes=[pltpu.VMEM((block_m, block_n), jnp.float32)],
            compiler_params=pltpu.CompilerParams(
                dimension_semantics=("parallel", "parallel", "arbitrary"),
                vmem_limit_bytes=vmem_limit),
        )(xp, wp, bp)

    if out.shape != (m, n):
        out = out[:m, :n]
    return out.reshape(orig_shape[:-1] + (n,))


# -------------------------------- PreNorm -------------------------------------

class PallasLinear:
    """Linear(dim_in -> dim_out) backed by the Pallas matmul kernels."""

    def __init__(self, w, b, mxu_dtype=_DEF_MXU_DTYPE):
        self.w = w
        self.b = b
        self.mxu_dtype = mxu_dtype

    def __call__(self, x):
        return linear_pallas(x, self.w, self.b, mxu_dtype=self.mxu_dtype)


class PreNorm:
    """LayerNorm(dim) followed by `fn`, mirroring the PyTorch module."""

    def __init__(self, dim, fn, eps=1e-5):
        # nn.LayerNorm default init: weight=1, bias=0 (deterministic).
        self.gamma = jnp.ones((dim,), jnp.float32)
        self.beta = jnp.zeros((dim,), jnp.float32)
        self.eps = eps
        self.fn = fn

    def __call__(self, x, **kwargs):
        # Fast path: fn is a PallasLinear -> LN fused into the matmul kernel
        # (no HBM round trip for the normalized tensor).
        if isinstance(self.fn, PallasLinear) and not kwargs:
            return fused_prenorm_linear_pallas(
                x, self.gamma, self.beta, self.fn.w, self.fn.b,
                eps=self.eps, mxu_dtype=self.fn.mxu_dtype)
        # TODO(synk): arbitrary `fn` callables cannot be fused into the LN kernel.
        return self.fn(layernorm_pallas(x, self.gamma, self.beta, eps=self.eps),
                       **kwargs)


# --------------------------------- main ----------------------------------------

if __name__ == "__main__":
    B, S, D = 2, 8, 32
    key = jax.random.PRNGKey(0)
    kx, kw, kb = jax.random.split(key, 3)

    x = jax.random.normal(kx, (B, S, D), dtype=jnp.float32)
    w = jax.random.normal(kw, (D, D), dtype=jnp.float32) * 0.02
    b = jax.random.normal(kb, (D,), dtype=jnp.float32) * 0.01

    # 1) Fused path (resident W, bf16 MXU by default).
    prenorm_fused = PreNorm(D, PallasLinear(w, b))
    out_fused = jax.block_until_ready(prenorm_fused(x))

    # 2) Fused path with f32 MXU (exact-precision check).
    out_fused_f32 = jax.block_until_ready(
        fused_prenorm_linear_pallas(x, prenorm_fused.gamma, prenorm_fused.beta,
                                    w, b, mxu_dtype=jnp.float32))

    # 3) Streaming-W fused fallback (forced) — exercises the LN-scratch kernel.
    out_stream = jax.block_until_ready(
        fused_prenorm_linear_pallas(x, prenorm_fused.gamma, prenorm_fused.beta,
                                    w, b, w_resident_bytes=0))

    # 4) Generic-fn path: standalone LN kernel + resident-W Pallas linear.
    prenorm_generic = PreNorm(D, lambda y: linear_pallas(y, w, b))
    out_generic = jax.block_until_ready(prenorm_generic(x))

    # 5) K-reduction linear fallback (forced) after the standalone LN kernel.
    ln_out = layernorm_pallas(x, prenorm_fused.gamma, prenorm_fused.beta)
    out_reduce = jax.block_until_ready(
        linear_pallas(ln_out, w, b, w_resident_bytes=0,
                      block_n=128, block_k=128))

    # Pure-JAX reference (PyTorch LayerNorm semantics; gamma=1, beta=0).
    mean = jnp.mean(x, axis=-1, keepdims=True)
    var = jnp.mean((x - mean) ** 2, axis=-1, keepdims=True)
    ln_ref = (x - mean) * jax.lax.rsqrt(var + 1e-5)
    out_ref = jnp.einsum("bsd,de->bse", ln_ref, w) + b

    assert out_fused.shape == (B, S, D)
    assert out_generic.shape == (B, S, D)
    # f32-MXU path must match tightly; bf16-MXU paths use a bf16-appropriate tol.
    assert jnp.allclose(out_fused_f32, out_ref, rtol=1e-4, atol=1e-5), \
        "fused (f32 MXU) PreNorm mismatch vs reference"
    for name, val in (("fused bf16", out_fused), ("fused streaming", out_stream),
                      ("generic", out_generic), ("k-reduction linear", out_reduce)):
        assert jnp.allclose(val, out_ref, rtol=2e-2, atol=2e-2), \
            f"{name} PreNorm mismatch vs reference"

    print("KERNEL_OK")
</pallas_src>

<mosaic_0001>
module attributes {stable_mosaic.version = 11 : i64} {
  func.func @_fused_resident_kernel(%arg0: i32, %arg1: memref<16x128xf32, #tpu.memory_space<vmem>>, %arg2: memref<1x128xf32, #tpu.memory_space<vmem>>, %arg3: memref<1x128xf32, #tpu.memory_space<vmem>>, %arg4: memref<1x128xf32, #tpu.memory_space<vmem>>, %arg5: memref<128x128xbf16, #tpu.memory_space<vmem>>, %arg6: memref<1x128xf32, #tpu.memory_space<vmem>>, %arg7: memref<16x128xf32, #tpu.memory_space<vmem>>) attributes {dimension_semantics = [#tpu.dimension_semantics<parallel>], iteration_bounds = array<i64: 1>, scalar_prefetch = 0 : i64, scratch_operands = 0 : i64, tpu.core_type = #tpu.core_type<tc>, window_params = [{transform_indices = @transform_0, window_bounds = array<i64: 16, 128>}, {pipeline_mode = #tpu.pipeline_mode<synchronous>, transform_indices = @transform_1, window_bounds = array<i64: 1, 128>}, {pipeline_mode = #tpu.pipeline_mode<synchronous>, transform_indices = @transform_2, window_bounds = array<i64: 1, 128>}, {pipeline_mode = #tpu.pipeline_mode<synchronous>, transform_indices = @transform_3, window_bounds = array<i64: 1, 128>}, {pipeline_mode = #tpu.pipeline_mode<synchronous>, transform_indices = @transform_4, window_bounds = array<i64: 128, 128>}, {pipeline_mode = #tpu.pipeline_mode<synchronous>, transform_indices = @transform_5, window_bounds = array<i64: 1, 128>}, {transform_indices = @transform_6, window_bounds = array<i64: 16, 128>}]} {
    %c0 = arith.constant 0 : index
    %c0_0 = arith.constant 0 : index
    %0 = vector.load %arg1[%c0, %c0_0] : memref<16x128xf32, #tpu.memory_space<vmem>>, vector<16x128xf32>
    %c0_1 = arith.constant 0 : index
    %c0_2 = arith.constant 0 : index
    %1 = vector.load %arg2[%c0_1, %c0_2] : memref<1x128xf32, #tpu.memory_space<vmem>>, vector<1x128xf32>
    %c0_3 = arith.constant 0 : index
    %c0_4 = arith.constant 0 : index
    %2 = vector.load %arg3[%c0_3, %c0_4] : memref<1x128xf32, #tpu.memory_space<vmem>>, vector<1x128xf32>
    %c0_5 = arith.constant 0 : index
    %c0_6 = arith.constant 0 : index
    %3 = vector.load %arg4[%c0_5, %c0_6] : memref<1x128xf32, #tpu.memory_space<vmem>>, vector<1x128xf32>
    %cst = arith.constant dense<0.000000e+00> : vector<16xf32>
    %4 = vector.multi_reduction <add>, %0, %cst [1] : vector<16x128xf32> to vector<16xf32>
    %5 = vector.shape_cast %4 : vector<16xf32> to vector<16x1xf32>
    %cst_7 = arith.constant 3.125000e-02 : f32
    %6 = vector.broadcast %cst_7 : f32 to vector<16x1xf32>
    %7 = arith.mulf %5, %6 : vector<16x1xf32>
    %8 = vector.broadcast %7 : vector<16x1xf32> to vector<16x128xf32>
    %9 = arith.subf %0, %8 : vector<16x128xf32>
    %10 = vector.broadcast %3 : vector<1x128xf32> to vector<16x128xf32>
    %11 = arith.mulf %9, %10 : vector<16x128xf32>
    %12 = arith.mulf %11, %11 : vector<16x128xf32>
    %cst_8 = arith.constant dense<0.000000e+00> : vector<16xf32>
    %13 = vector.multi_reduction <add>, %12, %cst_8 [1] : vector<16x128xf32> to vector<16xf32>
    %14 = vector.shape_cast %13 : vector<16xf32> to vector<16x1xf32>
    %cst_9 = arith.constant 3.125000e-02 : f32
    %15 = vector.broadcast %cst_9 : f32 to vector<16x1xf32>
    %16 = arith.mulf %14, %15 : vector<16x1xf32>
    %cst_10 = arith.constant 9.99999974E-6 : f32
    %17 = vector.broadcast %cst_10 : f32 to vector<16x1xf32>
    %18 = arith.addf %16, %17 : vector<16x1xf32>
    %19 = math.rsqrt %18 : vector<16x1xf32>
    %20 = vector.broadcast %19 : vector<16x1xf32> to vector<16x128xf32>
    %21 = arith.mulf %9, %20 : vector<16x128xf32>
    %22 = vector.broadcast %1 : vector<1x128xf32> to vector<16x128xf32>
    %23 = arith.mulf %21, %22 : vector<16x128xf32>
    %24 = vector.broadcast %2 : vector<1x128xf32> to vector<16x128xf32>
    %25 = arith.addf %23, %24 : vector<16x128xf32>
    %26 = arith.truncf %25 : vector<16x128xf32> to vector<16x128xbf16>
    %c0_11 = arith.constant 0 : index
    %c0_12 = arith.constant 0 : index
    %27 = vector.load %arg5[%c0_11, %c0_12] : memref<128x128xbf16, #tpu.memory_space<vmem>>, vector<128x128xbf16>
    %cst_13 = arith.constant dense<0.000000e+00> : vector<16x128xf32>
    %28 = tpu.matmul %26, %27, %cst_13 {dimension_numbers = #tpu.dot_dimension_numbers<[1], [0], [0], [1], [0, 0, 1, 1], [], []>} : vector<16x128xbf16>, vector<128x128xbf16>, vector<16x128xf32> -> vector<16x128xf32>
    %c0_14 = arith.constant 0 : index
    %c0_15 = arith.constant 0 : index
    %29 = vector.load %arg6[%c0_14, %c0_15] : memref<1x128xf32, #tpu.memory_space<vmem>>, vector<1x128xf32>
    %30 = vector.broadcast %29 : vector<1x128xf32> to vector<16x128xf32>
    %31 = arith.addf %28, %30 : vector<16x128xf32>
    %c0_16 = arith.constant 0 : index
    %c0_17 = arith.constant 0 : index
    %32 = vector.load %arg7[%c0_16, %c0_17] : memref<16x128xf32, #tpu.memory_space<vmem>>, vector<16x128xf32>
    tpu.vector_store %arg7[%c0_16, %c0_17], %31 {strides = array<i32>} : memref<16x128xf32, #tpu.memory_space<vmem>>, vector<16x128xf32>,
    return
  }
  func.func @transform_0(%arg0: i32) -> (i32, i32) {
    %c0_i32 = arith.constant 0 : i32
    %c0_i32_0 = arith.constant 0 : i32
    return %arg0, %c0_i32 : i32, i32
  }
  func.func @transform_1(%arg0: i32) -> (i32, i32) {
    %c0_i32 = arith.constant 0 : i32
    %c0_i32_0 = arith.constant 0 : i32
    %c0_i32_1 = arith.constant 0 : i32
    return %c0_i32, %c0_i32_0 : i32, i32
  }
  func.func @transform_2(%arg0: i32) -> (i32, i32) {
    %c0_i32 = arith.constant 0 : i32
    %c0_i32_0 = arith.constant 0 : i32
    %c0_i32_1 = arith.constant 0 : i32
    return %c0_i32, %c0_i32_0 : i32, i32
  }
  func.func @transform_3(%arg0: i32) -> (i32, i32) {
    %c0_i32 = arith.constant 0 : i32
    %c0_i32_0 = arith.constant 0 : i32
    %c0_i32_1 = arith.constant 0 : i32
    return %c0_i32, %c0_i32_0 : i32, i32
  }
  func.func @transform_4(%arg0: i32) -> (i32, i32) {
    %c0_i32 = arith.constant 0 : i32
    %c0_i32_0 = arith.constant 0 : i32
    %c0_i32_1 = arith.constant 0 : i32
    return %c0_i32, %c0_i32_0 : i32, i32
  }
  func.func @transform_5(%arg0: i32) -> (i32, i32) {
    %c0_i32 = arith.constant 0 : i32
    %c0_i32_0 = arith.constant 0 : i32
    %c0_i32_1 = arith.constant 0 : i32
    return %c0_i32, %c0_i32_0 : i32, i32
  }
  func.func @transform_6(%arg0: i32) -> (i32, i32) {
    %c0_i32 = arith.constant 0 : i32
    %c0_i32_0 = arith.constant 0 : i32
    return %arg0, %c0_i32 : i32, i32
  }
}

</mosaic_0001>

<bundles_post_ra>
// kernel: tpu_custom_call.1
= control target key start
LH: loop header
LB: loop body
LE: loop exit
PB: predicated region body
PF: predicated region fallthrough
CT: control target
= control target key end

     0   :  { %11 = vsyncpa [#allocation3], 0  ;;  %s469_s0 = inlined_call_operand.hbm [shape: f32[16,128], index: 0, kind: input, shape index: {}]   ;;  %s470_s1 = inlined_call_operand.vmem [shape: f32[1,128], index: 1, kind: input, shape index: {}]   ;;  %s471_s2 = inlined_call_operand.vmem [shape: f32[1,128], index: 2, kind: input, shape index: {}]   ;;  %s472_s3 = inlined_call_operand.vmem [shape: f32[1,128], index: 3, kind: input, shape index: {}]   ;;  %s473_s4 = inlined_call_operand.hbm [shape: bf16[128,128], index: 4, kind: input, shape index: {}]   ;;  %s474_s5 = inlined_call_operand.vmem [shape: f32[1,128], index: 5, kind: input, shape index: {}]   ;;  %s475_s6 = inlined_call_operand.hbm [shape: f32[16,128], index: 6, kind: output, shape index: {}]  }
   0x1   :  { %12 = vsyncpa [#allocation6], 0 }
   0x2   :  { %13 = vsyncpa [#allocation4], 0  ;;  %s371_s21 = smov [#allocation2]   ;;  %s299_s25 = scalar_lea.hbm %s469_s0, 256 }
   0x3   :  { %s19_s22 = sshll.u32 %s371_s21, 4  ;;  %p300_p0 = scmp.ne.s32.totalorder %s469_s0, %s299_s25  ;;  %s20_s22 = int_to_ptr.vmem [resolvable:$true] %s19_s22 }
   0x4   :  { %p303_p1 = scmp.lt.u32.totalorder %s299_s25, %s469_s0 }
   0x6   :  { %p305_p2 = pnand %p303_p1, %p300_p0 }
   0x8   :  { %308 = shalt.err (!%p305_p2)
}
   0x9   :  { %s309_s30 = scalar_lea.vmem %s20_s22, 256  ;;  %p314_p4 = scmp.lt.s32.totalorder %s20_s22, %s20_s22 }
   0xa   :  { %p310_p3 = scmp.ne.s32.totalorder %s20_s22, %s309_s30  ;;  %p315_p5 = scmp.lt.s32.totalorder %s309_s30, %s309_s30 }
   0xc   :  { %p316_p6 = por %p315_p5, %p314_p4 }
   0xe   :  { %p317_p7 = pnand %p316_p6, %p310_p3 }
  0x10   :  { %320 = shalt.err (!%p317_p7)
}
  0x11   :  { %s372_s7 = smov 128   ;;  %s373_s8 = smov 8  }
  0x12   :  { %25 = dma.hbm_to_vmem [thread:$0]  %s469_s0, 256, %s20_s22, [#allocation3], %s372_s7, %s372_s7, %s373_s8  }
  0x13   :  { %s374_s11 = smov [#allocation5]   ;;  %s321_s15 = scalar_lea.hbm %s473_s4, 1024 }
  0x14   :  { %s37_s12 = sshll.u32 %s374_s11, 4  ;;  %p322_p8 = scmp.ne.s32.totalorder %s473_s4, %s321_s15  ;;  %s38_s12 = int_to_ptr.vmem [resolvable:$true] %s37_s12 }
  0x15   :  { %p325_p9 = scmp.lt.u32.totalorder %s321_s15, %s473_s4 }
  0x17   :  { %p327_p10 = pnand %p325_p9, %p322_p8 }
  0x19   :  { %330 = shalt.err (!%p327_p10)
}
  0x1a   :  { %s331_s20 = scalar_lea.vmem %s38_s12, 1024  ;;  %p336_p12 = scmp.lt.s32.totalorder %s38_s12, %s38_s12 }
  0x1b   :  { %p332_p11 = scmp.ne.s32.totalorder %s38_s12, %s331_s20  ;;  %p337_p13 = scmp.lt.s32.totalorder %s331_s20, %s331_s20 }
  0x1d   :  { %p338_p0 = por %p337_p13, %p336_p12 }
  0x1f   :  { %p339_p1 = pnand %p338_p0, %p332_p11 }
  0x21   :  { %342 = shalt.err (!%p339_p1)
}
  0x22   :  { %s375_s0 = smov 64   ;;  %s376_s21 = smov 4  }
  0x23   :  { %43 = dma.hbm_to_vmem [thread:$0]  %s473_s4, 1024, %s38_s12, [#allocation6], %s375_s0, %s375_s0, %s376_s21  }
  0x24   :  { %365 = dma.done.wait [#allocation3], 256  }
  0x25   :  { %366 = vsyncadd [#allocation3], 4294967040 }
  0x26   :  { %367 = dma.done.wait [#allocation6], 1024  }
  0x27   :  { %368 = vsyncadd [#allocation6], 4294966272  ;;  %v53_v0 = vld [vmem:[#allocation2] sm:$0xff]  ;;  %v54_v1 = vld [vmem:[#allocation2 + $0x8] sm:$0xff]  ;;  %v377_v3 = vmov 0.0   ;;  %vm378_vm0 = vmmov 0  }
  0x28   :  { %58 = vadd.xlane.f32.xlu0 %v53_v0  ;;  %v287_v2 = vld [vmem:[#allocation5] sm:$0xff]   ;;  %258 = vmatprep.subr.bf16.mxu0 %v377_v3  ;;  %v237_v6 = vld [vmem:[%s472_s3] ss:$0 sm:$0xff]  ;;  %v288_v15 = vld [vmem:[#allocation5 + $0x8] sm:$0xff]   ;;  %s379_s30 = smov [#allocation7]  }
  0x29   :  { %259 = vmatpush3.bf16.msra.mxu0 %v287_v2  ;;  %v289_v16 = vld [vmem:[#allocation5 + $0x10] sm:$0xff]   ;;  %v290_v17 = vld [vmem:[#allocation5 + $0x18] sm:$0xff]   ;;  %v291_v18 = vld [vmem:[#allocation5 + $0x20] sm:$0xff]   ;;  %274 = vmatprep.mubr.msk.bf16.mxu0 %vm378_vm0, %v377_v3  ;;  %s224_s9 = sshll.u32 %s379_s30, 4  ;;  %s225_s9 = int_to_ptr.vmem [resolvable:$true] %s224_s9 }
  0x2a   :  { %260 = vmatprep.subr.bf16.mxu0 %v377_v3  ;;  %v292_v19 = vld [vmem:[#allocation5 + $0x28] sm:$0xff]   ;;  %v293_v20 = vld [vmem:[#allocation5 + $0x30] sm:$0xff]   ;;  %v294_v21 = vld [vmem:[#allocation5 + $0x38] sm:$0xff]   ;;  %p348_p3 = scmp.lt.s32.totalorder %s225_s9, %s225_s9 }
  0x2b   :  { %v238_v30 = vld [vmem:[%s470_s1] ss:$0 sm:$0xff]  ;;  %s343_s1 = scalar_lea.vmem %s225_s9, 256 }
  0x2c   :  { %60 = vadd.xlane.f32.xlu0 %v54_v1  ;;  %v239_v34 = vld [vmem:[%s471_s2] ss:$0 sm:$0xff]  ;;  %p344_p2 = scmp.ne.s32.totalorder %s225_s9, %s343_s1  ;;  %p349_p4 = scmp.lt.s32.totalorder %s343_s1, %s343_s1 }
  0x2d   :  { %261 = vmatpush3.bf16.msra.mxu0 %v288_v15  ;;  %v240_v39 = vld [vmem:[%s474_s5] ss:$0 sm:$0xff] }
  0x2e   :  { %262 = vmatprep.subr.bf16.mxu0 %v377_v3  ;;  %p350_p5 = por %p349_p4, %p348_p3 }
  0x30   :  { %p351_p6 = pnand %p350_p5, %p344_p2 }
  0x31   :  { %263 = vmatpush3.bf16.msra.mxu0 %v289_v16 }
  0x32   :  { %264 = vmatprep.subr.bf16.mxu0 %v377_v3 }
  0x35   :  { %265 = vmatpush3.bf16.msra.mxu0 %v290_v17 }
  0x36   :  { %266 = vmatprep.subr.bf16.mxu0 %v377_v3 }
  0x39   :  { %267 = vmatpush3.bf16.msra.mxu0 %v291_v18 }
  0x3a   :  { %268 = vmatprep.subr.bf16.mxu0 %v377_v3 }
  0x3d   :  { %269 = vmatpush3.bf16.msra.mxu0 %v292_v19 }
  0x3e   :  { %270 = vmatprep.subr.bf16.mxu0 %v377_v3 }
  0x41   :  { %271 = vmatpush3.bf16.msra.mxu0 %v293_v20 }
  0x42   :  { %272 = vmatprep.subr.bf16.mxu0 %v377_v3 }
  0x45   :  { %273 = vmatpush3.bf16.msra.mxu0 %v294_v21 }
  0xb5   :  { %v59_v4 = vpop.xlane.xlu0 %58 }
  0xb6   :  { %v62_v5 = vmul.f32 0.03125, %v59_v4 }
  0xb8   :  { %v64_v7 = vsub.f32 %v53_v0, %v62_v5 }
  0xb9   :  { %v61_v8 = vpop.xlane.xlu0 %60 }
  0xba   :  { %v63_v9 = vmul.f32 0.03125, %v61_v8  ;;  %v72_v10 = vmul.f32 %v237_v6, %v64_v7 }
  0xbc   :  { %v65_v11 = vsub.f32 %v54_v1, %v63_v9  ;;  %v74_v12 = vmul.f32 %v72_v10, %v72_v10 }
  0xbe   :  { %76 = vadd.xlane.f32.xlu1 %v74_v12  ;;  %v73_v13 = vmul.f32 %v237_v6, %v65_v11 }
  0xc0   :  { %v75_v14 = vmul.f32 %v73_v13, %v73_v13 }
  0xc2   :  { %78 = vadd.xlane.f32.xlu1 %v75_v14 }
 0x14b   :  { %v77_v22 = vpop.xlane.xlu1 %76 }
 0x14c   :  { %v80_v23 = vmul.f32 0.03125, %v77_v22 }
 0x14e   :  { %v82_v24 = vadd.f32 1e-05, %v80_v23 }
 0x14f   :  { %v79_v25 = vpop.xlane.xlu1 %78 }
 0x150   :  { %295 = vrsqrt.f32 %v82_v24  ;;  %v81_v26 = vmul.f32 0.03125, %v79_v25 }
 0x152   :  { %v83_v27 = vadd.f32 1e-05, %v81_v26 }
 0x154   :  { %297 = vrsqrt.f32 %v83_v27 }
 0x15a   :  { %v296_v28 = vpop.eup %295 }
 0x15b   :  { %v86_v29 = vmul.f32 %v296_v28, %v64_v7 }
 0x15d   :  { %v94_v33 = vmul.f32 %v238_v30, %v86_v29 }
 0x15e   :  { %v298_v31 = vpop.eup %297 }
 0x15f   :  { %v87_v32 = vmul.f32 %v298_v31, %v65_v11  ;;  %v102_v36 = vadd.f32 %v239_v34, %v94_v33 }
 0x161   :  { %v95_v35 = vmul.f32 %v238_v30, %v87_v32 }
 0x163   :  { %v103_v37 = vadd.f32 %v239_v34, %v95_v35 }
 0x165   :  { %v104_v38 = vpack.c.bf16 %v103_v37, %v102_v36 }
 0x167   :  { %275 = vmatmul.mubr.bf16.vlgmr.msra.gmra.mrb[0].mxu0 %v104_v38 }
 0x23a   :  { %v210_v40 = vpop.f32.mrb[0].mxu0 }
 0x23b   :  { %v211_v41 = vadd.f32 %v240_v39, %v210_v40  ;;  %v276_v42 = vpop.f32.mrb[1].mxu0 }
 0x23c   :  { %v213_v43 = vpop.f32.mrb[2].mxu0 }
 0x23d   :  { %217 = vst [vmem:[#allocation7] sm:$0xff] %v211_v41  ;;  %v214_v44 = vadd.f32 %v240_v39, %v213_v43  ;;  %v277_v45 = vpop.f32.mrb[3].mxu0 }
 0x23f   :  { %218 = vst [vmem:[#allocation7 + $0x8] sm:$0xff] %v214_v44 }
 0x240   :  { %354 = shalt.err (!%p351_p6)
}
 0x241   :  { %s355_s10 = scalar_lea.hbm %s475_s6, 256 }
 0x242   :  { %p356_p7 = scmp.ne.s32.totalorder %s475_s6, %s355_s10  ;;  %p359_p8 = scmp.lt.u32.totalorder %s355_s10, %s475_s6 }
 0x244   :  { %p361_p9 = pnand %p359_p8, %p356_p7 }
 0x246   :  { %364 = shalt.err (!%p361_p9)
}
 0x247   :  { %230 = dma.vmem_to_hbm [thread:$0]  %s225_s9, 256, %s475_s6, [#allocation4], %s372_s7, %s372_s7, %s373_s8  }
 0x248   :  { %369 = dma.done.wait [#allocation4], 256  }
 0x249   :  { %370 = vsyncadd [#allocation4], 4294967040 }
 0x24a   :  { %234 = vsyncpa [#allocation3], 1 }
 0x24b   :  { %235 = vsyncpa [#allocation6], 1 }
 0x24c   :  { %236 = vsyncpa [#allocation4], 1 }

</bundles_post_ra>
